<compile_context>
chip_gen: v7x
topology: tpu7x:2x2x1
jax: 0.10.0
libtpu: 0.0.40
codegen_flags: <defaults>
</compile_context>

<pallas_src>
import functools

import jax
import jax.numpy as jnp
import numpy as np
from jax.experimental import pallas as pl
from jax.experimental.pallas import tpu as pltpu


def _round_up(x, m):
    return ((x + m - 1) // m) * m


def _hann_window_np(win_length):
    # torch.hann_window(N) is periodic: 0.5 - 0.5*cos(2*pi*n/N), n in [0, N)
    n = np.arange(win_length, dtype=np.float64)
    return (0.5 - 0.5 * np.cos(2.0 * np.pi * n / win_length)).astype(np.float32)


# torch F.pad mode name -> jnp.pad mode name
_PAD_MODE_MAP = {"reflect": "reflect", "constant": "constant",
                 "replicate": "edge", "circular": "wrap"}

_BASIS_CACHE = {}


def _windowed_dft_basis(n_fft, n_freqs, n_out, window, w_dtype):
    """W = [win*cos | -win*sin], (n_fft, n_out); built host-side & cached."""
    n = np.arange(n_fft, dtype=np.float64)
    f = np.arange(n_freqs, dtype=np.float64)
    ang = 2.0 * np.pi * np.outer(n, f) / n_fft           # (n_fft, n_freqs)
    cos_b, sin_b = np.cos(ang), np.sin(ang)
    try:
        win = np.asarray(window, dtype=np.float64).reshape(-1)
        if win.shape[0] < n_fft:                          # torch.stft center-pads window
            lp = (n_fft - win.shape[0]) // 2
            win = np.pad(win, (lp, n_fft - win.shape[0] - lp))
        key = (n_fft, n_freqs, n_out, np.dtype(w_dtype).name, win.tobytes())
        if key not in _BASIS_CACHE:
            w = np.concatenate([win[:, None] * cos_b, -(win[:, None] * sin_b)], axis=1)
            w = np.pad(w, ((0, 0), (0, n_out - 2 * n_freqs))).astype(np.float32)
            _BASIS_CACHE[key] = jnp.asarray(w, dtype=w_dtype)
        return _BASIS_CACHE[key]
    except Exception:
        # Traced window: transcendentals still host-side, only the multiply on device.
        win = jnp.reshape(window, (-1,)).astype(jnp.float32)
        if win.shape[0] < n_fft:
            lp = (n_fft - win.shape[0]) // 2
            win = jnp.pad(win, (lp, n_fft - win.shape[0] - lp))
        win = win[:, None]
        w = jnp.concatenate([win * jnp.asarray(cos_b, jnp.float32),
                             -(win * jnp.asarray(sin_b, jnp.float32))], axis=1)
        w = jnp.pad(w, ((0, 0), (0, n_out - 2 * n_freqs)))
        return w.astype(w_dtype)


def _vmem_budget():
    cap = 64 << 20
    try:
        info = pltpu.get_tpu_info()
        cap = int(getattr(info, "vmem_capacity_bytes", cap) or cap)
    except Exception:
        pass
    return max(24 << 20, min((cap * 3) // 4, 100 << 20))


def _stft_frames_kernel(*refs, hop, n_shifts):
    """Accumulate S hop-shifted (tile_f, hop) @ (hop, n_out) matmuls into out_ref."""
    if n_shifts > 1:
        cur_ref, nxt_ref, w_ref, out_ref = refs
    else:
        cur_ref, w_ref, out_ref = refs
    tile_f = cur_ref.shape[1]
    cur = cur_ref[0]                                            # (tile_f, hop) f32
    # shift s = 0
    out_ref[0] = jnp.dot(cur, w_ref[0:hop, :], preferred_element_type=jnp.float32)
    if n_shifts > 1:
        both = jnp.concatenate([cur, nxt_ref[0]], axis=0)       # (2*tile_f, hop)
        for s in range(1, n_shifts):                            # static, small (<=16)
            out_ref[0] += jnp.dot(both[s:s + tile_f, :],
                                  w_ref[s * hop:(s + 1) * hop, :],
                                  preferred_element_type=jnp.float32)


def _stft_matmul(chunks, w, *, tile_f, chunk_w, n_shifts, n_f_tiles, n_out, vmem_limit):
    """chunks (B, C_pad, chunk_w) f32, w (n_shifts*chunk_w, n_out) -> (B, F_pad, n_out) f32."""
    B = chunks.shape[0]
    kernel = functools.partial(_stft_frames_kernel, hop=chunk_w, n_shifts=n_shifts)

    in_specs = [pl.BlockSpec((1, tile_f, chunk_w), lambda b, i: (b, i, 0))]
    args = [chunks]
    if n_shifts > 1:
        in_specs.append(pl.BlockSpec((1, tile_f, chunk_w), lambda b, i: (b, i + 1, 0)))
        args.append(chunks)
    # Basis: full-array block, constant index -> fetched once, VMEM resident.
    in_specs.append(pl.BlockSpec((w.shape[0], n_out), lambda b, i: (0, 0)))
    args.append(w)

    return pl.pallas_call(
        kernel,
        out_shape=jax.ShapeDtypeStruct((B, n_f_tiles * tile_f, n_out), jnp.float32),
        grid_spec=pltpu.PrefetchScalarGridSpec(
            num_scalar_prefetch=0,
            grid=(B, n_f_tiles),
            in_specs=in_specs,
            out_specs=pl.BlockSpec((1, tile_f, n_out), lambda b, i: (b, i, 0)),
        ),
        compiler_params=pltpu.CompilerParams(
            dimension_semantics=("parallel", "parallel"),
            vmem_limit_bytes=int(vmem_limit),
        ),
    )(*args)


def stft_pallas(waveforms, fft_length, hop_length=None, win_length=None,
                window=None, center=True, pad_mode='reflect',
                normalized=False, onesided=True):
    n_fft = int(fft_length)
    hop = int(hop_length) if hop_length is not None else n_fft // 4
    if window is None:
        window = _hann_window_np(int(win_length) if win_length is not None else n_fft)

    leading = waveforms.shape[:-1]
    T = waveforms.shape[-1]
    x = jnp.asarray(waveforms, jnp.float32).reshape(-1, T)
    if center:
        pad = n_fft // 2
        x = jnp.pad(x, ((0, 0), (pad, pad)), mode=_PAD_MODE_MAP.get(pad_mode, pad_mode))
    B, L = x.shape
    if L < n_fft:
        raise ValueError("input is shorter than fft_length")
    F = 1 + (L - n_fft) // hop

    n_freqs = n_fft // 2 + 1 if onesided else n_fft
    n_out = _round_up(2 * n_freqs, 128)                   # lane-dense kernel output
    w_dtype = jnp.float32 if (2 * n_fft * n_out * 4) <= (16 << 20) else jnp.bfloat16
    w = _windowed_dft_basis(n_fft, n_freqs, n_out, window, w_dtype)
    w_bytes = 2 if w_dtype == jnp.bfloat16 else 4

    # ---- choose path: hop-decomposed (no gather) vs materialized-frames fallback
    use_hop_decomp = (hop <= n_fft) and (n_fft % hop == 0) and (n_fft // hop <= 16)
    if use_hop_decomp:
        n_shifts = n_fft // hop
        chunk_w = hop
    else:
        n_shifts = 1
        chunk_w = n_fft
    n_lhs_specs = 2 if n_shifts > 1 else 1

    # ---- frame tiling under a per-generation VMEM budget
    budget = _vmem_budget()
    tile_f = min(512, _round_up(max(F, 8), 8))
    if B == 1 and F > 8:
        # keep >=2 parallel tiles so v7x's second TensorCore has work
        tile_f = min(tile_f, _round_up(pl.cdiv(F, 2), 8))

    chunk_w_l = _round_up(chunk_w, 128)                   # VMEM lane padding

    def _vmem_need(tf):
        lhs = (n_lhs_specs * 2 + 2) * tf * chunk_w_l * 4  # blocks + concat temp
        basis = 2 * n_fft * n_out * w_bytes               # (conservatively) double-buffered
        out = 4 * tf * n_out * 4                          # out blocks + dot temporaries
        return lhs + basis + out + (2 << 20)

    while _vmem_need(tile_f) > budget and tile_f > 8:
        tile_f = max(8, _round_up(tile_f // 2, 8))
    vmem_limit = min(max(_vmem_need(tile_f), 8 << 20), budget)

    n_f_tiles = pl.cdiv(F, tile_f)
    F_pad = n_f_tiles * tile_f

    # ---- build the kernel LHS
    if use_hop_decomp:
        extra = 1 if n_shifts > 1 else 0                  # lookahead tile for "next" block
        n_chunk_rows = max((n_f_tiles + extra) * tile_f, pl.cdiv(L, hop))
        xr = jnp.pad(x, ((0, 0), (0, n_chunk_rows * hop - L)))
        chunks = xr.reshape(B, n_chunk_rows, hop)         # pure reshape, no amplification
    else:
        # Fallback (hop does not divide n_fft, or n_fft/hop too large): gather frames.
        starts = jnp.arange(F) * hop
        idx = starts[:, None] + jnp.arange(n_fft)[None, :]
        frames = x[:, idx]                                # (B, F, n_fft)
        chunks = jnp.pad(frames, ((0, 0), (0, F_pad - F), (0, 0)))

    out = _stft_matmul(chunks, w, tile_f=tile_f, chunk_w=chunk_w, n_shifts=n_shifts,
                       n_f_tiles=n_f_tiles, n_out=n_out, vmem_limit=vmem_limit)

    # ---- back to torch.stft layout: (*, n_freqs, F, 2)
    real = out[:, :F, :n_freqs]
    imag = out[:, :F, n_freqs:2 * n_freqs]
    spec = jnp.stack([real, imag], axis=-1)               # (B, F, n_freqs, 2)
    spec = jnp.transpose(spec, (0, 2, 1, 3))              # (B, n_freqs, F, 2)
    if normalized:
        spec = spec / jnp.sqrt(jnp.float32(n_fft))
    return spec.reshape(leading + (n_freqs, F, 2))


class STFT:
    """JAX/Pallas equivalent of the PyTorch STFT module (hann window buffer)."""

    def __init__(self, fft_length, hop_length=None, win_length=None, window=None,
                 center=True, pad_mode='reflect', normalized=False, onesided=True):
        self.fft_length = fft_length
        self.hop_length = hop_length
        self.win_length = win_length
        self.center = center
        self.pad_mode = pad_mode
        self.normalized = normalized
        self.onesided = onesided
        if window is None:
            window = _hann_window_np(win_length if win_length is not None else fft_length)
        self.window = window
        # TODO(synk): _ModuleNoStateBuffers' state_dict buffer filtering is pure
        # nn.Module bookkeeping and has no kernel equivalent.

    def __call__(self, waveforms):
        return stft_pallas(waveforms, self.fft_length, hop_length=self.hop_length,
                           win_length=self.win_length, window=self.window,
                           center=self.center, pad_mode=self.pad_mode,
                           normalized=self.normalized, onesided=self.onesided)


def _reference_stft(waveforms, fft_length, hop_length, window):
    """Pure-JAX reference via rfft (matches torch.stft conventions)."""
    leading = waveforms.shape[:-1]
    T = waveforms.shape[-1]
    x = waveforms.reshape(-1, T).astype(jnp.float32)
    pad = fft_length // 2
    x = jnp.pad(x, ((0, 0), (pad, pad)), mode='reflect')
    L = x.shape[-1]
    num_frames = 1 + (L - fft_length) // hop_length
    starts = jnp.arange(num_frames) * hop_length
    idx = starts[:, None] + jnp.arange(fft_length)[None, :]
    frames = x[:, idx] * window[None, None, :]             # (B, F, n_fft)
    spec_c = jnp.fft.rfft(frames, axis=-1)                 # (B, F, n_freqs)
    spec = jnp.stack([spec_c.real, spec_c.imag], axis=-1)  # (B, F, n_freqs, 2)
    spec = jnp.transpose(spec, (0, 2, 1, 3))               # (B, n_freqs, F, 2)
    return spec.reshape(leading + spec.shape[1:])


if __name__ == "__main__":
    key = jax.random.PRNGKey(0)
    batch, channel, time = 2, 2, 64
    fft_length = 16                                        # hop defaults to 4, hann(16)
    waveforms = jax.random.normal(key, (batch, channel, time), dtype=jnp.float32)

    module = STFT(fft_length)
    out = jax.jit(lambda wv: module(wv))(waveforms)
    out = jax.block_until_ready(out)

    # shape check: (*, channel, n_freqs, n_frames, 2)
    n_freqs = fft_length // 2 + 1
    n_frames = 1 + time // (fft_length // 4)
    assert out.shape == (batch, channel, n_freqs, n_frames, 2), out.shape

    # numerical check against a pure-JAX rfft reference
    ref = _reference_stft(waveforms, fft_length, fft_length // 4,
                          jnp.asarray(_hann_window_np(fft_length)))
    np.testing.assert_allclose(np.asarray(out), np.asarray(ref),
                               rtol=2e-2, atol=3e-2)

    print("KERNEL_OK")
</pallas_src>

<mosaic_0001>
module attributes {stable_mosaic.version = 11 : i64} {
  func.func @_stft_frames_kernel(%arg0: i32, %arg1: i32, %arg2: memref<1x24x4xf32, #tpu.memory_space<vmem>>, %arg3: memref<1x24x4xf32, #tpu.memory_space<vmem>>, %arg4: memref<16x128xf32, #tpu.memory_space<vmem>>, %arg5: memref<1x24x128xf32, #tpu.memory_space<vmem>>) attributes {dimension_semantics = [#tpu.dimension_semantics<parallel>, #tpu.dimension_semantics<parallel>], iteration_bounds = array<i64: 4, 1>, scalar_prefetch = 0 : i64, scratch_operands = 0 : i64, tpu.core_type = #tpu.core_type<tc>, window_params = [{transform_indices = @transform_0, window_bounds = array<i64: 1, 24, 4>}, {transform_indices = @transform_1, window_bounds = array<i64: 1, 24, 4>}, {pipeline_mode = #tpu.pipeline_mode<synchronous>, transform_indices = @transform_2, window_bounds = array<i64: 16, 128>}, {transform_indices = @transform_3, window_bounds = array<i64: 1, 24, 128>}]} {
    %c0 = arith.constant 0 : index
    %c0_0 = arith.constant 0 : index
    %c0_1 = arith.constant 0 : index
    %0 = vector.load %arg2[%c0, %c0_0, %c0_1] : memref<1x24x4xf32, #tpu.memory_space<vmem>>, vector<1x24x4xf32>
    %1 = vector.shape_cast %0 : vector<1x24x4xf32> to vector<24x4xf32>
    %c0_2 = arith.constant 0 : index
    %c0_3 = arith.constant 0 : index
    %2 = vector.load %arg4[%c0_2, %c0_3] : memref<16x128xf32, #tpu.memory_space<vmem>>, vector<4x128xf32>
    %cst = arith.constant dense<0.000000e+00> : vector<24x128xf32>
    %3 = tpu.matmul %1, %2, %cst {dimension_numbers = #tpu.dot_dimension_numbers<[1], [0], [0], [1], [0, 0, 1, 1], [], []>} : vector<24x4xf32>, vector<4x128xf32>, vector<24x128xf32> -> vector<24x128xf32>
    %c0_4 = arith.constant 0 : index
    %c0_5 = arith.constant 0 : index
    %c0_6 = arith.constant 0 : index
    %4 = vector.load %arg5[%c0_4, %c0_5, %c0_6] : memref<1x24x128xf32, #tpu.memory_space<vmem>>, vector<1x24x128xf32>
    %5 = vector.shape_cast %4 : vector<1x24x128xf32> to vector<24x128xf32>
    %6 = vector.shape_cast %3 : vector<24x128xf32> to vector<1x24x128xf32>
    tpu.vector_store %arg5[%c0_4, %c0_5, %c0_6], %6 {strides = array<i32>} : memref<1x24x128xf32, #tpu.memory_space<vmem>>, vector<1x24x128xf32>,
    %c0_7 = arith.constant 0 : index
    %c0_8 = arith.constant 0 : index
    %c0_9 = arith.constant 0 : index
    %7 = vector.load %arg3[%c0_7, %c0_8, %c0_9] : memref<1x24x4xf32, #tpu.memory_space<vmem>>, vector<1x24x4xf32>
    %8 = vector.shape_cast %7 : vector<1x24x4xf32> to vector<24x4xf32>
    %9 = tpu.concatenate %1, %8 in 0 : vector<24x4xf32>, vector<24x4xf32> -> vector<48x4xf32>
    %c0_10 = arith.constant 0 : index
    %c0_11 = arith.constant 0 : index
    %c0_12 = arith.constant 0 : index
    %10 = vector.load %arg5[%c0_10, %c0_11, %c0_12] : memref<1x24x128xf32, #tpu.memory_space<vmem>>, vector<1x24x128xf32>
    %11 = vector.shape_cast %10 : vector<1x24x128xf32> to vector<24x128xf32>
    %12 = vector.extract_strided_slice %9 {offsets = [1, 0], sizes = [24, 4], strides = [1, 1]} : vector<48x4xf32> to vector<24x4xf32>
    %c4 = arith.constant 4 : index
    %c0_13 = arith.constant 0 : index
    %13 = vector.load %arg4[%c4, %c0_13] : memref<16x128xf32, #tpu.memory_space<vmem>>, vector<4x128xf32>
    %cst_14 = arith.constant dense<0.000000e+00> : vector<24x128xf32>
    %14 = tpu.matmul %12, %13, %cst_14 {dimension_numbers = #tpu.dot_dimension_numbers<[1], [0], [0], [1], [0, 0, 1, 1], [], []>} : vector<24x4xf32>, vector<4x128xf32>, vector<24x128xf32> -> vector<24x128xf32>
    %15 = arith.addf %11, %14 : vector<24x128xf32>
    %c0_15 = arith.constant 0 : index
    %c0_16 = arith.constant 0 : index
    %c0_17 = arith.constant 0 : index
    %16 = vector.load %arg5[%c0_15, %c0_16, %c0_17] : memref<1x24x128xf32, #tpu.memory_space<vmem>>, vector<1x24x128xf32>
    %17 = vector.shape_cast %16 : vector<1x24x128xf32> to vector<24x128xf32>
    %18 = vector.shape_cast %15 : vector<24x128xf32> to vector<1x24x128xf32>
    tpu.vector_store %arg5[%c0_15, %c0_16, %c0_17], %18 {strides = array<i32>} : memref<1x24x128xf32, #tpu.memory_space<vmem>>, vector<1x24x128xf32>,
    %c0_18 = arith.constant 0 : index
    %c0_19 = arith.constant 0 : index
    %c0_20 = arith.constant 0 : index
    %19 = vector.load %arg5[%c0_18, %c0_19, %c0_20] : memref<1x24x128xf32, #tpu.memory_space<vmem>>, vector<1x24x128xf32>
    %20 = vector.shape_cast %19 : vector<1x24x128xf32> to vector<24x128xf32>
    %21 = vector.extract_strided_slice %9 {offsets = [2, 0], sizes = [24, 4], strides = [1, 1]} : vector<48x4xf32> to vector<24x4xf32>
    %c8 = arith.constant 8 : index
    %c0_21 = arith.constant 0 : index
    %22 = vector.load %arg4[%c8, %c0_21] : memref<16x128xf32, #tpu.memory_space<vmem>>, vector<4x128xf32>
    %cst_22 = arith.constant dense<0.000000e+00> : vector<24x128xf32>
    %23 = tpu.matmul %21, %22, %cst_22 {dimension_numbers = #tpu.dot_dimension_numbers<[1], [0], [0], [1], [0, 0, 1, 1], [], []>} : vector<24x4xf32>, vector<4x128xf32>, vector<24x128xf32> -> vector<24x128xf32>
    %24 = arith.addf %20, %23 : vector<24x128xf32>
    %c0_23 = arith.constant 0 : index
    %c0_24 = arith.constant 0 : index
    %c0_25 = arith.constant 0 : index
    %25 = vector.load %arg5[%c0_23, %c0_24, %c0_25] : memref<1x24x128xf32, #tpu.memory_space<vmem>>, vector<1x24x128xf32>
    %26 = vector.shape_cast %25 : vector<1x24x128xf32> to vector<24x128xf32>
    %27 = vector.shape_cast %24 : vector<24x128xf32> to vector<1x24x128xf32>
    tpu.vector_store %arg5[%c0_23, %c0_24, %c0_25], %27 {strides = array<i32>} : memref<1x24x128xf32, #tpu.memory_space<vmem>>, vector<1x24x128xf32>,
    %c0_26 = arith.constant 0 : index
    %c0_27 = arith.constant 0 : index
    %c0_28 = arith.constant 0 : index
    %28 = vector.load %arg5[%c0_26, %c0_27, %c0_28] : memref<1x24x128xf32, #tpu.memory_space<vmem>>, vector<1x24x128xf32>
    %29 = vector.shape_cast %28 : vector<1x24x128xf32> to vector<24x128xf32>
    %30 = vector.extract_strided_slice %9 {offsets = [3, 0], sizes = [24, 4], strides = [1, 1]} : vector<48x4xf32> to vector<24x4xf32>
    %c12 = arith.constant 12 : index
    %c0_29 = arith.constant 0 : index
    %31 = vector.load %arg4[%c12, %c0_29] : memref<16x128xf32, #tpu.memory_space<vmem>>, vector<4x128xf32>
    %cst_30 = arith.constant dense<0.000000e+00> : vector<24x128xf32>
    %32 = tpu.matmul %30, %31, %cst_30 {dimension_numbers = #tpu.dot_dimension_numbers<[1], [0], [0], [1], [0, 0, 1, 1], [], []>} : vector<24x4xf32>, vector<4x128xf32>, vector<24x128xf32> -> vector<24x128xf32>
    %33 = arith.addf %29, %32 : vector<24x128xf32>
    %c0_31 = arith.constant 0 : index
    %c0_32 = arith.constant 0 : index
    %c0_33 = arith.constant 0 : index
    %34 = vector.load %arg5[%c0_31, %c0_32, %c0_33] : memref<1x24x128xf32, #tpu.memory_space<vmem>>, vector<1x24x128xf32>
    %35 = vector.shape_cast %34 : vector<1x24x128xf32> to vector<24x128xf32>
    %36 = vector.shape_cast %33 : vector<24x128xf32> to vector<1x24x128xf32>
    tpu.vector_store %arg5[%c0_31, %c0_32, %c0_33], %36 {strides = array<i32>} : memref<1x24x128xf32, #tpu.memory_space<vmem>>, vector<1x24x128xf32>,
    return
  }
  func.func @transform_0(%arg0: i32, %arg1: i32) -> (i32, i32, i32) {
    %c0_i32 = arith.constant 0 : i32
    %c0_i32_0 = arith.constant 0 : i32
    return %arg0, %arg1, %c0_i32 : i32, i32, i32
  }
  func.func @transform_1(%arg0: i32, %arg1: i32) -> (i32, i32, i32) {
    %c1_i32 = arith.constant 1 : i32
    %0 = arith.addi %arg1, %c1_i32 : i32
    %c0_i32 = arith.constant 0 : i32
    %c0_i32_0 = arith.constant 0 : i32
    return %arg0, %0, %c0_i32 : i32, i32, i32
  }
  func.func @transform_2(%arg0: i32, %arg1: i32) -> (i32, i32) {
    %c0_i32 = arith.constant 0 : i32
    %c0_i32_0 = arith.constant 0 : i32
    %c0_i32_1 = arith.constant 0 : i32
    return %c0_i32, %c0_i32_0 : i32, i32
  }
  func.func @transform_3(%arg0: i32, %arg1: i32) -> (i32, i32, i32) {
    %c0_i32 = arith.constant 0 : i32
    %c0_i32_0 = arith.constant 0 : i32
    return %arg0, %arg1, %c0_i32 : i32, i32, i32
  }
}

</mosaic_0001>

<bundles_post_ra>
// kernel: _lambda_.1
= control target key start
LH: loop header
LB: loop body
LE: loop exit
PB: predicated region body
PF: predicated region fallthrough
CT: control target
= control target key end

     0   :  { %s967_s12 = smov 0   ;;  %s969_s13 = smov 0   ;;  %s1072_s0 = inlined_call_operand.vmem [shape: f32[4,48,4], index: 0, kind: input, shape index: {}, may-alias: {0,1}]   ;;  %s1073_s1 = inlined_call_operand.vmem [shape: f32[4,48,4], index: 1, kind: input, shape index: {}, may-alias: {0,1}]   ;;  %s1074_s2 = inlined_call_operand.vmem [shape: f32[16,128], index: 2, kind: input, shape index: {}]   ;;  %s1075_s3 = inlined_call_operand.vmem [shape: f32[4,24,128], index: 3, kind: output, shape index: {}]  }
   0x1   :  { %s971_s14 = smov 0  }
   0x2 LB: > { %s25_s15 = sadd.s32 1, %s939_s13  ;;  %p786_p0 = scmp.ge.s32.totalorder %s943_s14, 1  ;;  %s943_s14 = sphi %s971_s14, %s13_s14   ;;  %s939_s13 = sphi %s969_s13, %s1077_s13   ;;  %s935_s12 = sphi %s967_s12, %s1076_s12  }
   0x3   : > { %p27_p1 = scmp.ge.s32.totalorder %s25_s15, 4  ;;  %p179_p2 = scmp.lt.s32.totalorder %s943_s14, 5 }
   0x5   : > { %s1079_s15 = smov (%p27_p1, %s25_s15), 0  ;;  %p180_p3 = pnand %p786_p0, %p179_p2 }
   0x6   : > { %v256_v0 = vld [vmem:[%s1074_s2] sm:$0xf] (!%p180_p3)  ;;  %vm267_vm0 = vcmask (!%p180_p3), 1043456   ;;  %p222_p4 = scmp.lt.s32.totalorder (!%p180_p3), %s935_s12, 3  ;;  %v945_v1 = vmov (!%p180_p3), 0.0   ;;  %vm946_vm1 = vmmov (!%p180_p3), 0  }
   0x7   : > { %183 = sbr.rel (%p180_p3) target bundleno = 257 (0x101), region = 32  ;;  %826 = vmatprep.subr.mxu1 (!%p180_p3), %v945_v1  ;;  %828 = vmatprep.mubr.msk.f32.mxu1 (!%p180_p3), %vm946_vm1, %v945_v1  ;;  %v466_v2 = vld [vmem:[%s1074_s2 + $0x8] sm:$0xf] (!%p180_p3)  ;;  %vm257_vm2 = vcmask (!%p180_p3), 31744   ;;  %v358_v3 = vld [vmem:[%s1074_s2 + $0x4] sm:$0xf] (!%p180_p3) }
   0x8   : > { %827 = vmatpush3.msk.msra.mxu1 (!%p180_p3), %vm267_vm0, %v256_v0  ;;  %848 = vmatprep.subr.mxu0 (!%p180_p3), %v945_v1  ;;  %vm467_vm3 = vcmask (!%p180_p3), 1045504   ;;  %v573_v12 = vld [vmem:[%s1074_s2 + $0xc] sm:$0xf] (!%p180_p3)  ;;  %vm360_vm4 = vcmask (!%p180_p3), 1046528   ;;  %vm574_vm5 = vcmask (!%p180_p3), 1044480  }
   0x9   : > { %837 = vmatprep.subr.mxu1 (!%p180_p3), %v945_v1  ;;  %849 = vmatpush3.msk.msra.mxu0 (!%p180_p3), %vm267_vm0, %v466_v2 }
   0xa   : > { %850 = vmatprep.mubr.msk.f32.mxu0 (!%p180_p3), %vm946_vm1, %v945_v1  ;;  %859 = vmatprep.subr.mxu0 (!%p180_p3), %v945_v1 }
   0xe   : > { %s1081_s12 = smov (!%p222_p4, %s935_s12), 3 }
   0xf   : > { %s891_s20 = smul.u32 48, %s1081_s12 }
  0x10   : > { %s893_s5 = smul.u32 24, %s1081_s12 }
  0x11   : > { %s229_s23 = scalar_lea.vmem %s1072_s0, %s891_s20  ;;  %s809_s24 = sadd.s32 24, %s891_s20 }
  0x12   : > { %s240_s29 = scalar_lea.vmem %s1073_s1, %s809_s24  ;;  %v253_v4 = vld [vmem:[%s229_s23] sm:$0xff]  ;;  %v254_v5 = vld [vmem:[%s229_s23 + $0x8] sm:$0xff]  ;;  %v255_v6 = vld [vmem:[%s229_s23 + $0x10] sm:$0xff]  ;;  %s251_s8 = scalar_lea.vmem %s1075_s3, %s893_s5 }
  0x13   : > { %829 = vmatmul.mubr.msk.f32.vlgmr.msra.gmra.mrb[0].mxu1 %vm257_vm2, %v253_v4  ;;  %v468_v7 = vrot.slane %v253_v4, 2  ;;  %v469_v8 = vrot.slane %v254_v5, 2  ;;  %v471_v9 = vrot.slane %v255_v6, 2  ;;  %v354_v10 = vld [vmem:[%s240_s29] sm:$0xff]  ;;  %v361_v13 = vrot.slane %v253_v4, 1 }
  0x14   : > { %838 = vmatpush3.msk.msra.mxu1 %vm267_vm0, %v358_v3  ;;  %831 = vmatprep.mubr.msk.f32.mxu1 %vm946_vm1, %v945_v1  ;;  %v362_v14 = vrot.slane %v254_v5, 1  ;;  %v473_v16 = vrot.slane %v354_v10, 2  ;;  %v575_v17 = vrot.slane %v253_v4, 3  ;;  %v576_v18 = vrot.slane %v254_v5, 3 }
  0x15   : > { %v470_v11 = vsel %vm467_vm3, %v468_v7, %v469_v8  ;;  %v472_v15 = vsel %vm467_vm3, %v469_v8, %v471_v9  ;;  %v364_v21 = vrot.slane %v255_v6, 1  ;;  %v578_v24 = vrot.slane %v255_v6, 3 }
  0x16   : > { %851 = vmatmul.mubr.msk.f32.vlgmr.msra.gmra.mrb[0].mxu0 %vm257_vm2, %v470_v11  ;;  %v474_v19 = vsel %vm467_vm3, %v471_v9, %v473_v16  ;;  %v363_v20 = vsel %vm360_vm4, %v361_v13, %v362_v14  ;;  %v577_v22 = vsel %vm574_vm5, %v575_v17, %v576_v18  ;;  %v366_v25 = vrot.slane %v354_v10, 1 }
  0x17   : > { %832 = vmatmul.mubr.msk.f32.gmra.mrb[2].mxu1 %vm257_vm2, %v254_v5  ;;  %853 = vmatprep.mubr.msk.f32.mxu0 %vm946_vm1, %v945_v1  ;;  %v365_v23 = vsel %vm360_vm4, %v362_v14, %v364_v21  ;;  %v579_v26 = vsel %vm574_vm5, %v576_v18, %v578_v24  ;;  %v580_v28 = vrot.slane %v354_v10, 3 }
  0x18   : > { %834 = vmatprep.mubr.msk.f32.mxu1 %vm946_vm1, %v945_v1  ;;  %860 = vmatpush3.msk.msra.mxu0 %vm267_vm0, %v573_v12  ;;  %v367_v27 = vsel %vm360_vm4, %v364_v21, %v366_v25 }
  0x19   : > { %v581_v29 = vsel %vm574_vm5, %v578_v24, %v580_v28 }
  0x1a   : > { %854 = vmatmul.mubr.msk.f32.gmra.mrb[2].mxu0 %vm257_vm2, %v472_v15 }
  0x1b   : > { %835 = vmatmul.mubr.msk.f32.gmra.mrb[4].mxu1 %vm257_vm2, %v255_v6  ;;  %856 = vmatprep.mubr.msk.f32.mxu0 %vm946_vm1, %v945_v1 }
  0x1c   : > { %839 = vmatprep.mubr.msk.f32.mxu1 %vm946_vm1, %v945_v1 }
  0x1e   : > { %857 = vmatmul.mubr.msk.f32.gmra.mrb[4].mxu0 %vm257_vm2, %v474_v19 }
  0x1f   : > { %840 = vmatmul.mubr.msk.f32.vlgmr.msra.gmra.mrb[0].mxu1 %vm257_vm2, %v363_v20  ;;  %861 = vmatprep.mubr.msk.f32.mxu0 %vm946_vm1, %v945_v1 }
  0x20   : > { %842 = vmatprep.mubr.msk.f32.mxu1 %vm946_vm1, %v945_v1 }
  0x22   : > { %862 = vmatmul.mubr.msk.f32.vlgmr.msra.gmra.mrb[0].mxu0 %vm257_vm2, %v577_v22 }
  0x23   : > { %843 = vmatmul.mubr.msk.f32.gmra.mrb[2].mxu1 %vm257_vm2, %v365_v23  ;;  %864 = vmatprep.mubr.msk.f32.mxu0 %vm946_vm1, %v945_v1 }
  0x24   : > { %845 = vmatprep.mubr.msk.f32.mxu1 %vm946_vm1, %v945_v1 }
  0x26   : > { %865 = vmatmul.mubr.msk.f32.gmra.mrb[2].mxu0 %vm257_vm2, %v579_v26 }
  0x27   : > { %846 = vmatmul.mubr.msk.f32.gmra.mrb[4].mxu1 %vm257_vm2, %v367_v27  ;;  %867 = vmatprep.mubr.msk.f32.mxu0 %vm946_vm1, %v945_v1 }
  0x2a   : > { %868 = vmatmul.mubr.msk.f32.gmra.mrb[4].mxu0 %vm257_vm2, %v581_v29 }
  0xf2   : > { %v443_v30 = vpop.f32.mrb[0].mxu1 }
  0xf3   : > { %v841_v31 = vpop.f32.mrb[1].mxu1 }
  0xf5   : > { %v657_v32 = vpop.f32.mrb[0].mxu0 }
  0xf6   : > { %v448_v33 = vpop.f32.mrb[2].mxu1  ;;  %v872_v34 = vadd.f32 %v657_v32, %v443_v30  ;;  %v863_v35 = vpop.f32.mrb[1].mxu0 }
  0xf7   : > { %v844_v36 = vpop.f32.mrb[3].mxu1 }
  0xf8   : > { %674 = vst [vmem:[%s251_s8] sm:$0xff] %v872_v34 }
  0xf9   : > { %v662_v37 = vpop.f32.mrb[2].mxu0 }
  0xfa   : > { %v453_v38 = vpop.f32.mrb[4].mxu1  ;;  %v875_v39 = vadd.f32 %v662_v37, %v448_v33  ;;  %v866_v40 = vpop.f32.mrb[3].mxu0 }
  0xfb   : > { %v847_v41 = vpop.f32.mrb[5].mxu1 }
  0xfc   : > { %675 = vst [vmem:[%s251_s8 + $0x8] sm:$0xff] %v875_v39 }
  0xfd   : > { %v667_v42 = vpop.f32.mrb[4].mxu0 }
  0xfe   : > { %v878_v43 = vadd.f32 %v667_v42, %v453_v38  ;;  %v869_v44 = vpop.f32.mrb[5].mxu0 }
 0x100   : > { %676 = vst [vmem:[%s251_s8 + $0x10] sm:$0xff] %v878_v43 }
 0x101 PF: > { %s13_s14 = sadd.s32 1, %s943_s14   ;;  %s1076_s12 = smov %s939_s13 }
 0x102   : > { %p10_p5 = scmp.ge.s32.totalorder %s13_s14, 6   ;;  %s1077_s13 = smov %s1079_s15 }
 0x104   :  { %12 = sbr.rel (!%p10_p5) target bundleno = 2 (0x2), region = 65 }

</bundles_post_ra>
